<compile_context>
chip_gen: v6e
topology: v6e:2x2x1
jax: 0.10.0
libtpu: 0.0.40
codegen_flags: <defaults>
</compile_context>

<pallas_src>
import functools

import jax
import jax.numpy as jnp
from jax.experimental import pallas as pl
from jax.experimental.pallas import tpu as pltpu


_LANE = 128          # lane (last-dim) tile
_SUBLANE_BF16 = 16   # sublane tile for bf16-packed operands


def _round_up(x, m):
    return ((x + m - 1) // m) * m


def _apply_activation(y, activation):
    if activation == "ReLU":
        return jnp.maximum(y, 0.0)
    if activation == "Sigmoid":
        return jax.nn.sigmoid(y)       # EUP transcendental (free slot)
    if activation == "Tanh":
        return jnp.tanh(y)
    # The PyTorch module adds no activation layer for any other string.
    return y


# ----------------------------------------------------------------------------
# Pallas kernel: whole MLP fused (chained matmuls, VMEM-resident intermediates)
# ----------------------------------------------------------------------------
def _mlp_kernel(x_ref, *refs, activation, n_layers):
    # refs = (w0, b0, w1, b1, ..., w_{L-1}, b_{L-1}, out)
    o_ref = refs[-1]
    y = x_ref[...]                                   # (TILE_N, Fin0_p) bf16
    for li in range(n_layers):
        w_ref = refs[2 * li]                         # (Fin_p, Fout_p) bf16
        b_ref = refs[2 * li + 1]                     # (1, Fout_p)     f32
        k = w_ref.shape[0]
        lhs = y if y.shape[1] == k else y[:, :k]     # drop inert pad lanes
        lhs = lhs.astype(jnp.bfloat16)               # bf16 operands, f32 acc
        acc = jnp.dot(lhs, w_ref[...], preferred_element_type=jnp.float32)
        acc = acc + b_ref[...]                       # folded BN + bias
        if li < n_layers - 1:                        # activation on hidden only
            acc = _apply_activation(acc, activation)
        # Dropout is the identity in eval mode.
        y = acc
    o_ref[...] = y.astype(o_ref.dtype)


# ----------------------------------------------------------------------------
# Parameter construction (deterministic, PyTorch-like init)
# ----------------------------------------------------------------------------
def init_params(key, input_size, output_size, hidden_layer_sizes):
    params = []
    prev = input_size
    sizes = list(hidden_layer_sizes) + [output_size]
    for li, size in enumerate(sizes):
        key, kw, kb = jax.random.split(key, 3)
        bound = 1.0 / float(prev) ** 0.5
        w = jax.random.uniform(kw, (size, prev), jnp.float32, -bound, bound)
        b = jax.random.uniform(kb, (size,), jnp.float32, -bound, bound)
        if li < len(hidden_layer_sizes):
            # Non-trivial BN "running" stats so the fold is actually exercised.
            key, kg, kbt, km, kv = jax.random.split(key, 5)
            bn = (jax.random.uniform(kg, (size,), jnp.float32, 0.5, 1.5),
                  jax.random.uniform(kbt, (size,), jnp.float32, -0.5, 0.5),
                  jax.random.uniform(km, (size,), jnp.float32, -0.5, 0.5),
                  jax.random.uniform(kv, (size,), jnp.float32, 0.5, 1.5))
        else:
            bn = None
        params.append({"w": w, "b": b, "bn": bn})
        prev = size
    return params


def prepare_params(params, eps=1e-5):
    """One-time prep: transpose, fold eval-mode BN + bias, cast, pad.

    Returns a list of (W', b') with
      W' : (Fin_p, Fout_p)  bf16 = W^T * scale   Fin_p  = round_up(Fin, 16)
      b' : (1, Fout_p)      f32  = b*scale+shift Fout_p = round_up(Fout, 128)
    Padding is applied AFTER the bf16 cast so padded rows/cols stay exactly 0.
    """
    prepared = []
    for layer in params:
        w, b, bn = layer["w"], layer["b"], layer["bn"]   # w: (Fout, Fin)
        w_t = w.T.astype(jnp.float32)                    # (Fin, Fout)
        b = b.astype(jnp.float32)
        if bn is not None:
            gamma, beta, rmean, rvar = bn
            scale = gamma / jnp.sqrt(rvar + eps)
            shift = beta - rmean * scale
            w_t = w_t * scale[None, :]
            b = b * scale + shift
        fin, fout = w_t.shape
        fin_p = _round_up(fin, _SUBLANE_BF16)
        fout_p = _round_up(fout, _LANE)
        w_bf16 = w_t.astype(jnp.bfloat16)
        w_pad = jnp.zeros((fin_p, fout_p), jnp.bfloat16).at[:fin, :fout].set(w_bf16)
        b_pad = jnp.zeros((1, fout_p), jnp.float32).at[0, :fout].set(b)
        prepared.append((w_pad, b_pad))
    return prepared


# ----------------------------------------------------------------------------
# Full forward pass (eval mode) — one fused pallas_call
# ----------------------------------------------------------------------------
def neural_network_forward(x, prepared, activation_function, output_size,
                           *, tile_n=512):
    N, fin = x.shape
    n_layers = len(prepared)
    fin0_p = int(prepared[0][0].shape[0])
    fout_p = int(prepared[-1][0].shape[1])

    # Batch tile: bf16 sublane multiple; big tiles amortize per-step overhead,
    # tiny batches stay at grid=(1,) (no pointless weight re-DMA per core).
    tile_n = min(tile_n, _round_up(N, _SUBLANE_BF16))
    tile_n = _round_up(tile_n, _SUBLANE_BF16)
    n_p = _round_up(N, tile_n)

    x_pad = jnp.zeros((n_p, fin0_p), jnp.bfloat16).at[:N, :fin].set(
        x.astype(jnp.bfloat16))

    flat_params = []
    for (w, b) in prepared:
        flat_params += [w, b]

    kernel = functools.partial(
        _mlp_kernel, activation=activation_function, n_layers=n_layers)

    # --- cost estimate (bf16 weights/x at real byte sizes, weights once) -----
    flops = 2 * n_p * sum(int(w.shape[0]) * int(w.shape[1]) for w, _ in prepared)
    transcendentals = 0
    if activation_function in ("Sigmoid", "Tanh"):
        transcendentals = n_p * sum(int(w.shape[1]) for w, _ in prepared[:-1])
    weight_bytes = sum(int(w.size) * 2 + int(b.size) * 4 for w, b in prepared)
    bytes_accessed = (int(x_pad.size) * 2 + weight_bytes + n_p * fout_p * 4)
    cost = pl.CostEstimate(flops=int(flops),
                           transcendentals=int(transcendentals),
                           bytes_accessed=int(bytes_accessed))

    # --- VMEM budget: weights resident once, x/out double-buffered -----------
    resident_bytes = weight_bytes + 2 * tile_n * fin0_p * 2 + 2 * tile_n * fout_p * 4
    vmem_limit = None
    if resident_bytes > 24 * 1024 * 1024:
        # TODO(synk): beyond ~48 MiB resident, switch to a per-layer streamed
        #             fallback (v7x has only 64 MiB physical VMEM per TC).
        vmem_limit = int(min(2 * resident_bytes, 60 * 1024 * 1024))
    compiler_params = pltpu.CompilerParams(
        dimension_semantics=("parallel",),
        vmem_limit_bytes=vmem_limit)

    out_spec = pl.BlockSpec((tile_n, fout_p), lambda i: (i, 0))
    out_shape = jax.ShapeDtypeStruct((n_p, fout_p), jnp.float32)

    def build_in_specs(single_buffer_weights):
        specs = [pl.BlockSpec((tile_n, fin0_p), lambda i: (i, 0))]
        for (w, b) in prepared:
            for arr in (w, b):
                shape = tuple(int(d) for d in arr.shape)
                if single_buffer_weights:
                    # Grid-invariant blocks: no need for double buffering.
                    specs.append(pl.BlockSpec(shape, lambda i: (0, 0),
                                              pipeline_mode=pl.Buffered(1)))
                else:
                    specs.append(pl.BlockSpec(shape, lambda i: (0, 0)))
        return specs

    last_err = None
    for single_buffer_weights in (True, False):
        try:
            out = pl.pallas_call(
                kernel,
                out_shape=out_shape,
                grid=(n_p // tile_n,),
                in_specs=build_in_specs(single_buffer_weights),
                out_specs=out_spec,
                compiler_params=compiler_params,
                cost_estimate=cost,
            )(x_pad, *flat_params)
            return out[:N, :output_size]
        except Exception as e:  # fallback if pipeline_mode unsupported
            last_err = e
    raise last_err


# ----------------------------------------------------------------------------
# Pure-JAX references
# ----------------------------------------------------------------------------
def reference_forward(x, params, activation_function, eps=1e-5):
    """Un-folded f32 math mirroring the PyTorch module in eval mode."""
    n_hidden = len(params) - 1
    y = x
    for li, layer in enumerate(params):
        w, b, bn = layer["w"], layer["b"], layer["bn"]
        y = y @ w.T + b
        if li < n_hidden:
            gamma, beta, rmean, rvar = bn
            scale = gamma / jnp.sqrt(rvar + eps)
            shift = beta - rmean * scale
            y = y * scale + shift
            y = _apply_activation(y, activation_function)
            # Dropout is the identity in eval mode.
    return y


def reference_forward_prepared(x, prepared, activation_function):
    """Pure-JAX mirror of the exact kernel math (bf16 operands, f32 acc)."""
    n, fin = x.shape
    fin0_p = int(prepared[0][0].shape[0])
    y = jnp.zeros((n, fin0_p), jnp.float32).at[:, :fin].set(x)
    for li, (w, b) in enumerate(prepared):
        k = int(w.shape[0])
        lhs = y[:, :k].astype(jnp.bfloat16)
        acc = jnp.dot(lhs, w, preferred_element_type=jnp.float32) + b
        if li < len(prepared) - 1:
            acc = _apply_activation(acc, activation_function)
        y = acc
    return y


if __name__ == "__main__":
    # Small config consistent with the module's __init__
    input_size = 32
    output_size = 16
    hidden_layer_sizes = [64, 32]
    activation_function = "ReLU"
    dropout_rate = 0.1  # identity in eval mode
    batch = 8

    key = jax.random.PRNGKey(0)
    key, kx, kp = jax.random.split(key, 3)

    x = jax.random.normal(kx, (batch, input_size), jnp.float32)
    params = init_params(kp, input_size, output_size, hidden_layer_sizes)

    # One-time parameter prep (transpose + BN/bias fold + bf16 cast + padding)
    # happens OUTSIDE the per-forward hot path.
    prepared = prepare_params(params)

    out = neural_network_forward(x, prepared, activation_function, output_size)
    out = jax.block_until_ready(out)
    assert out.shape == (batch, output_size)

    # Tight check vs a pure-JAX mirror of the same folded bf16 math.
    ref_exact = reference_forward_prepared(x, prepared, activation_function)
    ref_exact = ref_exact[:batch, :output_size]
    assert jnp.allclose(out, ref_exact, atol=1e-3, rtol=1e-3), \
        "mismatch vs folded bf16 reference"

    # Loose check vs the un-folded f32 module semantics (bf16 weight rounding).
    ref_f32 = reference_forward(x, params, activation_function)
    assert jnp.allclose(out, ref_f32, atol=5e-2, rtol=5e-2), \
        "mismatch vs f32 reference"

    print("KERNEL_OK")
</pallas_src>

<mosaic_0001>
module attributes {stable_mosaic.version = 11 : i64} {
  func.func @_mlp_kernel(%arg0: i32, %arg1: memref<16x32xbf16, #tpu.memory_space<vmem>>, %arg2: memref<32x128xbf16, #tpu.memory_space<vmem>>, %arg3: memref<1x128xf32, #tpu.memory_space<vmem>>, %arg4: memref<64x128xbf16, #tpu.memory_space<vmem>>, %arg5: memref<1x128xf32, #tpu.memory_space<vmem>>, %arg6: memref<32x128xbf16, #tpu.memory_space<vmem>>, %arg7: memref<1x128xf32, #tpu.memory_space<vmem>>, %arg8: memref<16x128xf32, #tpu.memory_space<vmem>>) attributes {dimension_semantics = [#tpu.dimension_semantics<parallel>], iteration_bounds = array<i64: 1>, scalar_prefetch = 0 : i64, scratch_operands = 0 : i64, tpu.core_type = #tpu.core_type<tc>, window_params = [{transform_indices = @transform_0, window_bounds = array<i64: 16, 32>}, {pipeline_mode = #tpu.pipeline_mode<synchronous>, transform_indices = @transform_1, window_bounds = array<i64: 32, 128>}, {pipeline_mode = #tpu.pipeline_mode<synchronous>, transform_indices = @transform_2, window_bounds = array<i64: 1, 128>}, {pipeline_mode = #tpu.pipeline_mode<synchronous>, transform_indices = @transform_3, window_bounds = array<i64: 64, 128>}, {pipeline_mode = #tpu.pipeline_mode<synchronous>, transform_indices = @transform_4, window_bounds = array<i64: 1, 128>}, {pipeline_mode = #tpu.pipeline_mode<synchronous>, transform_indices = @transform_5, window_bounds = array<i64: 32, 128>}, {pipeline_mode = #tpu.pipeline_mode<synchronous>, transform_indices = @transform_6, window_bounds = array<i64: 1, 128>}, {transform_indices = @transform_7, window_bounds = array<i64: 16, 128>}]} {
    %c0 = arith.constant 0 : index
    %c0_0 = arith.constant 0 : index
    %0 = vector.load %arg1[%c0, %c0_0] : memref<16x32xbf16, #tpu.memory_space<vmem>>, vector<16x32xbf16>
    %c0_1 = arith.constant 0 : index
    %c0_2 = arith.constant 0 : index
    %1 = vector.load %arg2[%c0_1, %c0_2] : memref<32x128xbf16, #tpu.memory_space<vmem>>, vector<32x128xbf16>
    %cst = arith.constant dense<0.000000e+00> : vector<16x128xf32>
    %2 = tpu.matmul %0, %1, %cst {dimension_numbers = #tpu.dot_dimension_numbers<[1], [0], [0], [1], [0, 0, 1, 1], [], []>} : vector<16x32xbf16>, vector<32x128xbf16>, vector<16x128xf32> -> vector<16x128xf32>
    %c0_3 = arith.constant 0 : index
    %c0_4 = arith.constant 0 : index
    %3 = vector.load %arg3[%c0_3, %c0_4] : memref<1x128xf32, #tpu.memory_space<vmem>>, vector<1x128xf32>
    %4 = vector.broadcast %3 : vector<1x128xf32> to vector<16x128xf32>
    %5 = arith.addf %2, %4 : vector<16x128xf32>
    %cst_5 = arith.constant 0.000000e+00 : f32
    %6 = vector.broadcast %cst_5 : f32 to vector<16x128xf32>
    %7 = arith.maximumf %5, %6 : vector<16x128xf32>
    %8 = vector.extract_strided_slice %7 {offsets = [0, 0], sizes = [16, 64], strides = [1, 1]} : vector<16x128xf32> to vector<16x64xf32>
    %9 = arith.truncf %8 : vector<16x64xf32> to vector<16x64xbf16>
    %c0_6 = arith.constant 0 : index
    %c0_7 = arith.constant 0 : index
    %10 = vector.load %arg4[%c0_6, %c0_7] : memref<64x128xbf16, #tpu.memory_space<vmem>>, vector<64x128xbf16>
    %cst_8 = arith.constant dense<0.000000e+00> : vector<16x128xf32>
    %11 = tpu.matmul %9, %10, %cst_8 {dimension_numbers = #tpu.dot_dimension_numbers<[1], [0], [0], [1], [0, 0, 1, 1], [], []>} : vector<16x64xbf16>, vector<64x128xbf16>, vector<16x128xf32> -> vector<16x128xf32>
    %c0_9 = arith.constant 0 : index
    %c0_10 = arith.constant 0 : index
    %12 = vector.load %arg5[%c0_9, %c0_10] : memref<1x128xf32, #tpu.memory_space<vmem>>, vector<1x128xf32>
    %13 = vector.broadcast %12 : vector<1x128xf32> to vector<16x128xf32>
    %14 = arith.addf %11, %13 : vector<16x128xf32>
    %cst_11 = arith.constant 0.000000e+00 : f32
    %15 = vector.broadcast %cst_11 : f32 to vector<16x128xf32>
    %16 = arith.maximumf %14, %15 : vector<16x128xf32>
    %17 = vector.extract_strided_slice %16 {offsets = [0, 0], sizes = [16, 32], strides = [1, 1]} : vector<16x128xf32> to vector<16x32xf32>
    %18 = arith.truncf %17 : vector<16x32xf32> to vector<16x32xbf16>
    %c0_12 = arith.constant 0 : index
    %c0_13 = arith.constant 0 : index
    %19 = vector.load %arg6[%c0_12, %c0_13] : memref<32x128xbf16, #tpu.memory_space<vmem>>, vector<32x128xbf16>
    %cst_14 = arith.constant dense<0.000000e+00> : vector<16x128xf32>
    %20 = tpu.matmul %18, %19, %cst_14 {dimension_numbers = #tpu.dot_dimension_numbers<[1], [0], [0], [1], [0, 0, 1, 1], [], []>} : vector<16x32xbf16>, vector<32x128xbf16>, vector<16x128xf32> -> vector<16x128xf32>
    %c0_15 = arith.constant 0 : index
    %c0_16 = arith.constant 0 : index
    %21 = vector.load %arg7[%c0_15, %c0_16] : memref<1x128xf32, #tpu.memory_space<vmem>>, vector<1x128xf32>
    %22 = vector.broadcast %21 : vector<1x128xf32> to vector<16x128xf32>
    %23 = arith.addf %20, %22 : vector<16x128xf32>
    %c0_17 = arith.constant 0 : index
    %c0_18 = arith.constant 0 : index
    %24 = vector.load %arg8[%c0_17, %c0_18] : memref<16x128xf32, #tpu.memory_space<vmem>>, vector<16x128xf32>
    tpu.vector_store %arg8[%c0_17, %c0_18], %23 {strides = array<i32>} : memref<16x128xf32, #tpu.memory_space<vmem>>, vector<16x128xf32>,
    return
  }
  func.func @transform_0(%arg0: i32) -> (i32, i32) {
    %c0_i32 = arith.constant 0 : i32
    %c0_i32_0 = arith.constant 0 : i32
    return %arg0, %c0_i32 : i32, i32
  }
  func.func @transform_1(%arg0: i32) -> (i32, i32) {
    %c0_i32 = arith.constant 0 : i32
    %c0_i32_0 = arith.constant 0 : i32
    %c0_i32_1 = arith.constant 0 : i32
    return %c0_i32, %c0_i32_0 : i32, i32
  }
  func.func @transform_2(%arg0: i32) -> (i32, i32) {
    %c0_i32 = arith.constant 0 : i32
    %c0_i32_0 = arith.constant 0 : i32
    %c0_i32_1 = arith.constant 0 : i32
    return %c0_i32, %c0_i32_0 : i32, i32
  }
  func.func @transform_3(%arg0: i32) -> (i32, i32) {
    %c0_i32 = arith.constant 0 : i32
    %c0_i32_0 = arith.constant 0 : i32
    %c0_i32_1 = arith.constant 0 : i32
    return %c0_i32, %c0_i32_0 : i32, i32
  }
  func.func @transform_4(%arg0: i32) -> (i32, i32) {
    %c0_i32 = arith.constant 0 : i32
    %c0_i32_0 = arith.constant 0 : i32
    %c0_i32_1 = arith.constant 0 : i32
    return %c0_i32, %c0_i32_0 : i32, i32
  }
  func.func @transform_5(%arg0: i32) -> (i32, i32) {
    %c0_i32 = arith.constant 0 : i32
    %c0_i32_0 = arith.constant 0 : i32
    %c0_i32_1 = arith.constant 0 : i32
    return %c0_i32, %c0_i32_0 : i32, i32
  }
  func.func @transform_6(%arg0: i32) -> (i32, i32) {
    %c0_i32 = arith.constant 0 : i32
    %c0_i32_0 = arith.constant 0 : i32
    %c0_i32_1 = arith.constant 0 : i32
    return %c0_i32, %c0_i32_0 : i32, i32
  }
  func.func @transform_7(%arg0: i32) -> (i32, i32) {
    %c0_i32 = arith.constant 0 : i32
    %c0_i32_0 = arith.constant 0 : i32
    return %arg0, %c0_i32 : i32, i32
  }
}

module attributes {stable_mosaic.version = 11 : i64} {
  func.func @_mlp_kernel(%arg0: i32, %arg1: memref<16x32xbf16, #tpu.memory_space<vmem>>, %arg2: memref<32x128xbf16, #tpu.memory_space<vmem>>, %arg3: memref<1x128xf32, #tpu.memory_space<vmem>>, %arg4: memref<64x128xbf16, #tpu.memory_space<vmem>>, %arg5: memref<1x128xf32, #tpu.memory_space<vmem>>, %arg6: memref<32x128xbf16, #tpu.memory_space<vmem>>, %arg7: memref<1x128xf32, #tpu.memory_space<vmem>>, %arg8: memref<16x128xf32, #tpu.memory_space<vmem>>) attributes {dimension_semantics = [#tpu.dimension_semantics<parallel>], iteration_bounds = array<i64: 1>, scalar_prefetch = 0 : i64, scratch_operands = 0 : i64, tpu.core_type = #tpu.core_type<tc>, window_params = [{transform_indices = @transform_0, window_bounds = array<i64: 16, 32>}, {pipeline_mode = #tpu.pipeline_mode<synchronous>, transform_indices = @transform_1, window_bounds = array<i64: 32, 128>}, {pipeline_mode = #tpu.pipeline_mode<synchronous>, transform_indices = @transform_2, window_bounds = array<i64: 1, 128>}, {pipeline_mode = #tpu.pipeline_mode<synchronous>, transform_indices = @transform_3, window_bounds = array<i64: 64, 128>}, {pipeline_mode = #tpu.pipeline_mode<synchronous>, transform_indices = @transform_4, window_bounds = array<i64: 1, 128>}, {pipeline_mode = #tpu.pipeline_mode<synchronous>, transform_indices = @transform_5, window_bounds = array<i64: 32, 128>}, {pipeline_mode = #tpu.pipeline_mode<synchronous>, transform_indices = @transform_6, window_bounds = array<i64: 1, 128>}, {transform_indices = @transform_7, window_bounds = array<i64: 16, 128>}]} {
    %c0 = arith.constant 0 : index
    %c0_0 = arith.constant 0 : index
    %0 = vector.load %arg1[%c0, %c0_0] : memref<16x32xbf16, #tpu.memory_space<vmem>>, vector<16x32xbf16>
    %c0_1 = arith.constant 0 : index
    %c0_2 = arith.constant 0 : index
    %1 = vector.load %arg2[%c0_1, %c0_2] : memref<32x128xbf16, #tpu.memory_space<vmem>>, vector<32x128xbf16>
    %cst = arith.constant dense<0.000000e+00> : vector<16x128xf32>
    %2 = tpu.matmul %0, %1, %cst {dimension_numbers = #tpu.dot_dimension_numbers<[1], [0], [0], [1], [0, 0, 1, 1], [], []>} : vector<16x32xbf16>, vector<32x128xbf16>, vector<16x128xf32> -> vector<16x128xf32>
    %c0_3 = arith.constant 0 : index
    %c0_4 = arith.constant 0 : index
    %3 = vector.load %arg3[%c0_3, %c0_4] : memref<1x128xf32, #tpu.memory_space<vmem>>, vector<1x128xf32>
    %4 = vector.broadcast %3 : vector<1x128xf32> to vector<16x128xf32>
    %5 = arith.addf %2, %4 : vector<16x128xf32>
    %cst_5 = arith.constant 0.000000e+00 : f32
    %6 = vector.broadcast %cst_5 : f32 to vector<16x128xf32>
    %7 = arith.maximumf %5, %6 : vector<16x128xf32>
    %8 = vector.extract_strided_slice %7 {offsets = [0, 0], sizes = [16, 64], strides = [1, 1]} : vector<16x128xf32> to vector<16x64xf32>
    %9 = arith.truncf %8 : vector<16x64xf32> to vector<16x64xbf16>
    %c0_6 = arith.constant 0 : index
    %c0_7 = arith.constant 0 : index
    %10 = vector.load %arg4[%c0_6, %c0_7] : memref<64x128xbf16, #tpu.memory_space<vmem>>, vector<64x128xbf16>
    %cst_8 = arith.constant dense<0.000000e+00> : vector<16x128xf32>
    %11 = tpu.matmul %9, %10, %cst_8 {dimension_numbers = #tpu.dot_dimension_numbers<[1], [0], [0], [1], [0, 0, 1, 1], [], []>} : vector<16x64xbf16>, vector<64x128xbf16>, vector<16x128xf32> -> vector<16x128xf32>
    %c0_9 = arith.constant 0 : index
    %c0_10 = arith.constant 0 : index
    %12 = vector.load %arg5[%c0_9, %c0_10] : memref<1x128xf32, #tpu.memory_space<vmem>>, vector<1x128xf32>
    %13 = vector.broadcast %12 : vector<1x128xf32> to vector<16x128xf32>
    %14 = arith.addf %11, %13 : vector<16x128xf32>
    %cst_11 = arith.constant 0.000000e+00 : f32
    %15 = vector.broadcast %cst_11 : f32 to vector<16x128xf32>
    %16 = arith.maximumf %14, %15 : vector<16x128xf32>
    %17 = vector.extract_strided_slice %16 {offsets = [0, 0], sizes = [16, 32], strides = [1, 1]} : vector<16x128xf32> to vector<16x32xf32>
    %18 = arith.truncf %17 : vector<16x32xf32> to vector<16x32xbf16>
    %c0_12 = arith.constant 0 : index
    %c0_13 = arith.constant 0 : index
    %19 = vector.load %arg6[%c0_12, %c0_13] : memref<32x128xbf16, #tpu.memory_space<vmem>>, vector<32x128xbf16>
    %cst_14 = arith.constant dense<0.000000e+00> : vector<16x128xf32>
    %20 = tpu.matmul %18, %19, %cst_14 {dimension_numbers = #tpu.dot_dimension_numbers<[1], [0], [0], [1], [0, 0, 1, 1], [], []>} : vector<16x32xbf16>, vector<32x128xbf16>, vector<16x128xf32> -> vector<16x128xf32>
    %c0_15 = arith.constant 0 : index
    %c0_16 = arith.constant 0 : index
    %21 = vector.load %arg7[%c0_15, %c0_16] : memref<1x128xf32, #tpu.memory_space<vmem>>, vector<1x128xf32>
    %22 = vector.broadcast %21 : vector<1x128xf32> to vector<16x128xf32>
    %23 = arith.addf %20, %22 : vector<16x128xf32>
    %c0_17 = arith.constant 0 : index
    %c0_18 = arith.constant 0 : index
    %24 = vector.load %arg8[%c0_17, %c0_18] : memref<16x128xf32, #tpu.memory_space<vmem>>, vector<16x128xf32>
    tpu.vector_store %arg8[%c0_17, %c0_18], %23 {strides = array<i32>} : memref<16x128xf32, #tpu.memory_space<vmem>>, vector<16x128xf32>,
    return
  }
  func.func @transform_0(%arg0: i32) -> (i32, i32) {
    %c0_i32 = arith.constant 0 : i32
    %c0_i32_0 = arith.constant 0 : i32
    return %arg0, %c0_i32 : i32, i32
  }
  func.func @transform_1(%arg0: i32) -> (i32, i32) {
    %c0_i32 = arith.constant 0 : i32
    %c0_i32_0 = arith.constant 0 : i32
    %c0_i32_1 = arith.constant 0 : i32
    return %c0_i32, %c0_i32_0 : i32, i32
  }
  func.func @transform_2(%arg0: i32) -> (i32, i32) {
    %c0_i32 = arith.constant 0 : i32
    %c0_i32_0 = arith.constant 0 : i32
    %c0_i32_1 = arith.constant 0 : i32
    return %c0_i32, %c0_i32_0 : i32, i32
  }
  func.func @transform_3(%arg0: i32) -> (i32, i32) {
    %c0_i32 = arith.constant 0 : i32
    %c0_i32_0 = arith.constant 0 : i32
    %c0_i32_1 = arith.constant 0 : i32
    return %c0_i32, %c0_i32_0 : i32, i32
  }
  func.func @transform_4(%arg0: i32) -> (i32, i32) {
    %c0_i32 = arith.constant 0 : i32
    %c0_i32_0 = arith.constant 0 : i32
    %c0_i32_1 = arith.constant 0 : i32
    return %c0_i32, %c0_i32_0 : i32, i32
  }
  func.func @transform_5(%arg0: i32) -> (i32, i32) {
    %c0_i32 = arith.constant 0 : i32
    %c0_i32_0 = arith.constant 0 : i32
    %c0_i32_1 = arith.constant 0 : i32
    return %c0_i32, %c0_i32_0 : i32, i32
  }
  func.func @transform_6(%arg0: i32) -> (i32, i32) {
    %c0_i32 = arith.constant 0 : i32
    %c0_i32_0 = arith.constant 0 : i32
    %c0_i32_1 = arith.constant 0 : i32
    return %c0_i32, %c0_i32_0 : i32, i32
  }
  func.func @transform_7(%arg0: i32) -> (i32, i32) {
    %c0_i32 = arith.constant 0 : i32
    %c0_i32_0 = arith.constant 0 : i32
    return %arg0, %c0_i32 : i32, i32
  }
}

</mosaic_0001>

<bundles_post_ra>
// kernel: tpu_custom_call.1
= control target key start
LH: loop header
LB: loop body
LE: loop exit
PB: predicated region body
PF: predicated region fallthrough
CT: control target
= control target key end

     0   :  { %12 = vsyncpa [#allocation3], 0  ;;  %s610_s0 = inlined_call_operand.hbm [shape: bf16[16,32], index: 0, kind: input, shape index: {}]   ;;  %s611_s1 = inlined_call_operand.hbm [shape: bf16[32,128], index: 1, kind: input, shape index: {}]   ;;  %s612_s2 = inlined_call_operand.vmem [shape: f32[1,128], index: 2, kind: input, shape index: {}]   ;;  %s613_s3 = inlined_call_operand.hbm [shape: bf16[64,128], index: 3, kind: input, shape index: {}]   ;;  %s614_s4 = inlined_call_operand.vmem [shape: f32[1,128], index: 4, kind: input, shape index: {}]   ;;  %s615_s5 = inlined_call_operand.hbm [shape: bf16[32,128], index: 5, kind: input, shape index: {}]   ;;  %s616_s6 = inlined_call_operand.vmem [shape: f32[1,128], index: 6, kind: input, shape index: {}]   ;;  %s617_s7 = inlined_call_operand.hbm [shape: f32[16,128], index: 7, kind: output, shape index: {}]  }
   0x1   :  { %13 = vsyncpa [#allocation6], 0 }
   0x2   :  { %14 = vsyncpa [#allocation9], 0 }
   0x3   :  { %15 = vsyncpa [#allocation4], 0  ;;  %s518_s24 = smov [#allocation5]   ;;  %s519_s26 = smov [#allocation2]  }
   0x4   :  { %s33_s25 = sshll.u32 %s518_s24, 4  ;;  %s21_s27 = sshll.u32 %s519_s26, 4  ;;  %s34_s25 = int_to_ptr.vmem [resolvable:$true] %s33_s25  ;;  %s22_s27 = int_to_ptr.vmem [resolvable:$true] %s21_s27 }
   0x5   :  { %s418_s28 = scalar_lea.vmem %s34_s25, 256  ;;  %p423_p1 = scmp.lt.s32.totalorder %s34_s25, %s34_s25 }
   0x6   :  { %p419_p0 = scmp.ne.s32.totalorder %s34_s25, %s418_s28  ;;  %p424_p2 = scmp.lt.s32.totalorder %s418_s28, %s418_s28 }
   0x8   :  { %p425_p3 = por %p424_p2, %p423_p1 }
   0xa   :  { %p426_p4 = pnand %p425_p3, %p419_p0 }
   0xc   :  { %429 = shalt.err (!%p426_p4)
}
   0xd   :  { %s520_s29 = smov 64   ;;  %s521_s30 = smov 4  }
   0xe   :  { %39 = dma.hbm_to_vmem [thread:$0]  %s611_s1, 256, %s34_s25, [#allocation6], %s520_s29, %s520_s29, %s521_s30  }
   0xf   :  { %s438_s10 = scalar_lea.vmem %s22_s27, 128  ;;  %p443_p6 = scmp.lt.s32.totalorder %s22_s27, %s22_s27 }
  0x10   :  { %p439_p5 = scmp.ne.s32.totalorder %s22_s27, %s438_s10  ;;  %p444_p7 = scmp.lt.s32.totalorder %s438_s10, %s438_s10 }
  0x12   :  { %p445_p8 = por %p444_p7, %p443_p6 }
  0x14   :  { %p446_p9 = pnand %p445_p8, %p439_p5 }
  0x16   :  { %449 = shalt.err (!%p446_p9)
}
  0x17   :  { %27 = dma.hbm_to_vmem [thread:$0]  %s610_s0, 128, %s22_s27, [#allocation3], %s520_s29, %s520_s29, %s521_s30  }
  0x18   :  { %s522_s13 = smov [#allocation7]   ;;  %s523_s15 = smov [#allocation8]  }
  0x19   :  { %s47_s14 = sshll.u32 %s522_s13, 4  ;;  %s61_s16 = sshll.u32 %s523_s15, 4  ;;  %s48_s14 = int_to_ptr.vmem [resolvable:$true] %s47_s14  ;;  %s62_s16 = int_to_ptr.vmem [resolvable:$true] %s61_s16 }
  0x1a   :  { %s458_s1 = scalar_lea.vmem %s48_s14, 512  ;;  %p463_p11 = scmp.lt.s32.totalorder %s48_s14, %s48_s14 }
  0x1b   :  { %p459_p10 = scmp.ne.s32.totalorder %s48_s14, %s458_s1  ;;  %p464_p12 = scmp.lt.s32.totalorder %s458_s1, %s458_s1 }
  0x1d   :  { %p465_p13 = por %p464_p12, %p463_p11 }
  0x1f   :  { %p466_p0 = pnand %p465_p13, %p459_p10 }
  0x21   :  { %469 = shalt.err (!%p466_p0)
}
  0x22   :  { %53 = dma.hbm_to_vmem [thread:$0]  %s613_s3, 512, %s48_s14, [#allocation6], %s520_s29, %s520_s29, %s521_s30  }
  0x23   :  { %s478_s0 = scalar_lea.vmem %s62_s16, 256  ;;  %p483_p2 = scmp.lt.s32.totalorder %s62_s16, %s62_s16 }
  0x24   :  { %p479_p1 = scmp.ne.s32.totalorder %s62_s16, %s478_s0  ;;  %p484_p3 = scmp.lt.s32.totalorder %s478_s0, %s478_s0 }
  0x26   :  { %p485_p4 = por %p484_p3, %p483_p2 }
  0x28   :  { %p486_p5 = pnand %p485_p4, %p479_p1 }
  0x2a   :  { %489 = shalt.err (!%p486_p5)
}
  0x2b   :  { %67 = dma.hbm_to_vmem [thread:$0]  %s615_s5, 256, %s62_s16, [#allocation9], %s520_s29, %s520_s29, %s521_s30  }
  0x2c   :  { %510 = dma.done.wait [#allocation3], 128  }
  0x2d   :  { %511 = vsyncadd [#allocation3], 4294967168 }
  0x2e   :  { %512 = dma.done.wait [#allocation6], 768  }
  0x2f   :  { %513 = vsyncadd [#allocation6], 4294966528 }
  0x30   :  { %514 = dma.done.wait [#allocation9], 256  }
  0x31   :  { %515 = vsyncadd [#allocation9], 4294967040  ;;  %v524_v0 = vmov 0.0   ;;  %vm525_vm0 = vmmov 0   ;;  %v401_v1 = vld [vmem:[#allocation5 + $0x8] sm:$0xff]   ;;  %v402_v2 = vld [vmem:[#allocation5] sm:$0xff]  }
  0x32   :  { %362 = vmatprep.subr.bf16.mxu0 %v524_v0  ;;  %366 = vmatprep.mubr.msk.bf16.mxu0 %vm525_vm0, %v524_v0  ;;  %v404_v3 = vld [vmem:[#allocation7 + $0x18] sm:$0xff]   ;;  %v403_v4 = vld [vmem:[#allocation2] sm:$0xff]   ;;  %vm113_vm1 = vcmask 261120   ;;  %v405_v5 = vld [vmem:[#allocation7 + $0x10] sm:$0xff]   ;;  %vm200_vm2 = vcmask 523264   ;;  %s526_s24 = smov [#allocation10]  }
  0x33   :  { %370 = vmatprep.subr.bf16.mxu1 %v524_v0  ;;  %378 = vmatprep.mubr.msk.bf16.mxu1 %vm525_vm0, %v524_v0  ;;  %v406_v6 = vld [vmem:[#allocation7 + $0x8] sm:$0xff]   ;;  %v407_v7 = vld [vmem:[#allocation7] sm:$0xff]   ;;  %s322_s25 = sshll.u32 %s526_s24, 4  ;;  %s323_s25 = int_to_ptr.vmem [resolvable:$true] %s322_s25 }
  0x34   :  { %363 = vmatpush3.bf16.msra.mxu0 %v401_v1  ;;  %371 = vmatpush3.bf16.msra.mxu1 %v404_v3  ;;  %v336_v8 = vld [vmem:[%s612_s2] ss:$0 sm:$0xff]  ;;  %v409_v19 = vld [vmem:[#allocation8] sm:$0xff]   ;;  %p495_p7 = scmp.lt.s32.totalorder %s323_s25, %s323_s25 }
  0x35   :  { %364 = vmatprep.subr.bf16.mxu0 %v524_v0  ;;  %372 = vmatprep.subr.bf16.mxu1 %v524_v0  ;;  %v408_v18 = vld [vmem:[#allocation8 + $0x8] sm:$0xff]  }
  0x36   :  { %v341_v20 = vld [vmem:[%s614_s4] ss:$0 sm:$0xff]  ;;  %s490_s4 = scalar_lea.vmem %s323_s25, 256 }
  0x37   :  { %v347_v30 = vld [vmem:[%s616_s6] ss:$0 sm:$0xff]  ;;  %p491_p6 = scmp.ne.s32.totalorder %s323_s25, %s490_s4  ;;  %p496_p8 = scmp.lt.s32.totalorder %s490_s4, %s490_s4 }
  0x38   :  { %365 = vmatpush3.bf16.msra.mxu0 %v402_v2  ;;  %373 = vmatpush3.bf16.msra.mxu1 %v405_v5 }
  0x39   :  { %382 = vmatprep.subr.bf16.mxu0 %v524_v0  ;;  %374 = vmatprep.subr.bf16.mxu1 %v524_v0  ;;  %p497_p9 = por %p496_p8, %p495_p7 }
  0x3b   :  { %367 = vmatmul.mubr.msk.bf16.vlgmr.msra.gmra.mxu0 %vm113_vm1, %v403_v4  ;;  %p498_p10 = pnand %p497_p9, %p491_p6 }
  0x3c   :  { %386 = vmatprep.mubr.msk.bf16.mxu0 %vm525_vm0, %v524_v0  ;;  %375 = vmatpush3.bf16.msra.mxu1 %v406_v6 }
  0x3d   :  { %376 = vmatprep.subr.bf16.mxu1 %v524_v0  ;;  %383 = vmatpush3.bf16.msra.mxu0 %v408_v18 }
  0x3e   :  { %384 = vmatprep.subr.bf16.mxu0 %v524_v0 }
  0x40   :  { %377 = vmatpush3.bf16.msra.mxu1 %v407_v7 }
  0x41   :  { %385 = vmatpush3.bf16.msra.mxu0 %v409_v19 }
  0xfb   :  { %v151_v9 = vpop.f32.mrf.mxu0 }
  0xfc   :  { %v152_v11 = vadd.f32 %v336_v8, %v151_v9 }
  0xfd   :  { %v368_v10 = vpop.f32.mrf.mxu0 }
  0xfe   :  { %v158_v15 = vmax.f32 %v152_v11, 0.0 }
  0xff   :  { %v154_v12 = vpop.f32.mrf.mxu0 }
 0x100   :  { %v155_v13 = vadd.f32 %v336_v8, %v154_v12 }
 0x101   :  { %v369_v14 = vpop.f32.mrf.mxu0 }
 0x102   :  { %v159_v16 = vmax.f32 %v155_v13, 0.0 }
 0x104   :  { %v160_v17 = vpack.c.bf16 %v159_v16, %v158_v15 }
 0x106   :  { %379 = vmatmul.mubr.msk.bf16.vlgmr.msra.gmra.mxu1 %vm200_vm2, %v160_v17 }
 0x1c6   :  { %v238_v21 = vpop.f32.mrf.mxu1 }
 0x1c7   :  { %v239_v23 = vadd.f32 %v341_v20, %v238_v21 }
 0x1c8   :  { %v380_v22 = vpop.f32.mrf.mxu1 }
 0x1c9   :  { %v245_v27 = vmax.f32 %v239_v23, 0.0 }
 0x1ca   :  { %v241_v24 = vpop.f32.mrf.mxu1 }
 0x1cb   :  { %v242_v25 = vadd.f32 %v341_v20, %v241_v24 }
 0x1cc   :  { %v381_v26 = vpop.f32.mrf.mxu1 }
 0x1cd   :  { %v246_v28 = vmax.f32 %v242_v25, 0.0 }
 0x1cf   :  { %v247_v29 = vpack.c.bf16 %v246_v28, %v245_v27 }
 0x1d1   :  { %387 = vmatmul.mubr.msk.bf16.vlgmr.msra.gmra.mxu0 %vm113_vm1, %v247_v29 }
 0x291   :  { %v308_v31 = vpop.f32.mrf.mxu0 }
 0x292   :  { %v309_v32 = vadd.f32 %v347_v30, %v308_v31 }
 0x293   :  { %v388_v33 = vpop.f32.mrf.mxu0 }
 0x294   :  { %315 = vst [vmem:[#allocation10] sm:$0xff] %v309_v32 }
 0x295   :  { %v311_v34 = vpop.f32.mrf.mxu0 }
 0x296   :  { %v312_v35 = vadd.f32 %v347_v30, %v311_v34 }
 0x297   :  { %v389_v36 = vpop.f32.mrf.mxu0 }
 0x298   :  { %316 = vst [vmem:[#allocation10 + $0x8] sm:$0xff] %v312_v35 }
 0x299   :  { %501 = shalt.err (!%p498_p10)
}
 0x29a   :  { %s527_s26 = smov 128   ;;  %s528_s6 = smov 8  }
 0x29b   :  { %328 = dma.vmem_to_hbm [thread:$0]  %s323_s25, 256, %s617_s7, [#allocation4], %s527_s26, %s527_s26, %s528_s6  }
 0x29c   :  { %516 = dma.done.wait [#allocation4], 256  }
 0x29d   :  { %517 = vsyncadd [#allocation4], 4294967040 }
 0x29e   :  { %332 = vsyncpa [#allocation3], 1 }
 0x29f   :  { %333 = vsyncpa [#allocation6], 1 }
 0x2a0   :  { %334 = vsyncpa [#allocation9], 1 }
 0x2a1   :  { %335 = vsyncpa [#allocation4], 1 }

// kernel: tpu_custom_call.1
= control target key start
LH: loop header
LB: loop body
LE: loop exit
PB: predicated region body
PF: predicated region fallthrough
CT: control target
= control target key end

     0   :  { %12 = vsyncpa [#allocation3], 0  ;;  %s610_s0 = inlined_call_operand.hbm [shape: bf16[16,32], index: 0, kind: input, shape index: {}]   ;;  %s611_s1 = inlined_call_operand.hbm [shape: bf16[32,128], index: 1, kind: input, shape index: {}]   ;;  %s612_s2 = inlined_call_operand.vmem [shape: f32[1,128], index: 2, kind: input, shape index: {}]   ;;  %s613_s3 = inlined_call_operand.hbm [shape: bf16[64,128], index: 3, kind: input, shape index: {}]   ;;  %s614_s4 = inlined_call_operand.vmem [shape: f32[1,128], index: 4, kind: input, shape index: {}]   ;;  %s615_s5 = inlined_call_operand.hbm [shape: bf16[32,128], index: 5, kind: input, shape index: {}]   ;;  %s616_s6 = inlined_call_operand.vmem [shape: f32[1,128], index: 6, kind: input, shape index: {}]   ;;  %s617_s7 = inlined_call_operand.hbm [shape: f32[16,128], index: 7, kind: output, shape index: {}]  }
   0x1   :  { %13 = vsyncpa [#allocation6], 0 }
   0x2   :  { %14 = vsyncpa [#allocation9], 0 }
   0x3   :  { %15 = vsyncpa [#allocation4], 0  ;;  %s518_s24 = smov [#allocation5]   ;;  %s519_s26 = smov [#allocation2]  }
   0x4   :  { %s33_s25 = sshll.u32 %s518_s24, 4  ;;  %s21_s27 = sshll.u32 %s519_s26, 4  ;;  %s34_s25 = int_to_ptr.vmem [resolvable:$true] %s33_s25  ;;  %s22_s27 = int_to_ptr.vmem [resolvable:$true] %s21_s27 }
   0x5   :  { %s418_s28 = scalar_lea.vmem %s34_s25, 256  ;;  %p423_p1 = scmp.lt.s32.totalorder %s34_s25, %s34_s25 }
   0x6   :  { %p419_p0 = scmp.ne.s32.totalorder %s34_s25, %s418_s28  ;;  %p424_p2 = scmp.lt.s32.totalorder %s418_s28, %s418_s28 }
   0x8   :  { %p425_p3 = por %p424_p2, %p423_p1 }
   0xa   :  { %p426_p4 = pnand %p425_p3, %p419_p0 }
   0xc   :  { %429 = shalt.err (!%p426_p4)
}
   0xd   :  { %s520_s29 = smov 64   ;;  %s521_s30 = smov 4  }
   0xe   :  { %39 = dma.hbm_to_vmem [thread:$0]  %s611_s1, 256, %s34_s25, [#allocation6], %s520_s29, %s520_s29, %s521_s30  }
   0xf   :  { %s438_s10 = scalar_lea.vmem %s22_s27, 128  ;;  %p443_p6 = scmp.lt.s32.totalorder %s22_s27, %s22_s27 }
  0x10   :  { %p439_p5 = scmp.ne.s32.totalorder %s22_s27, %s438_s10  ;;  %p444_p7 = scmp.lt.s32.totalorder %s438_s10, %s438_s10 }
  0x12   :  { %p445_p8 = por %p444_p7, %p443_p6 }
  0x14   :  { %p446_p9 = pnand %p445_p8, %p439_p5 }
  0x16   :  { %449 = shalt.err (!%p446_p9)
}
  0x17   :  { %27 = dma.hbm_to_vmem [thread:$0]  %s610_s0, 128, %s22_s27, [#allocation3], %s520_s29, %s520_s29, %s521_s30  }
  0x18   :  { %s522_s13 = smov [#allocation7]   ;;  %s523_s15 = smov [#allocation8]  }
  0x19   :  { %s47_s14 = sshll.u32 %s522_s13, 4  ;;  %s61_s16 = sshll.u32 %s523_s15, 4  ;;  %s48_s14 = int_to_ptr.vmem [resolvable:$true] %s47_s14  ;;  %s62_s16 = int_to_ptr.vmem [resolvable:$true] %s61_s16 }
  0x1a   :  { %s458_s1 = scalar_lea.vmem %s48_s14, 512  ;;  %p463_p11 = scmp.lt.s32.totalorder %s48_s14, %s48_s14 }
  0x1b   :  { %p459_p10 = scmp.ne.s32.totalorder %s48_s14, %s458_s1  ;;  %p464_p12 = scmp.lt.s32.totalorder %s458_s1, %s458_s1 }
  0x1d   :  { %p465_p13 = por %p464_p12, %p463_p11 }
  0x1f   :  { %p466_p0 = pnand %p465_p13, %p459_p10 }
  0x21   :  { %469 = shalt.err (!%p466_p0)
}
  0x22   :  { %53 = dma.hbm_to_vmem [thread:$0]  %s613_s3, 512, %s48_s14, [#allocation6], %s520_s29, %s520_s29, %s521_s30  }
  0x23   :  { %s478_s0 = scalar_lea.vmem %s62_s16, 256  ;;  %p483_p2 = scmp.lt.s32.totalorder %s62_s16, %s62_s16 }
  0x24   :  { %p479_p1 = scmp.ne.s32.totalorder %s62_s16, %s478_s0  ;;  %p484_p3 = scmp.lt.s32.totalorder %s478_s0, %s478_s0 }
  0x26   :  { %p485_p4 = por %p484_p3, %p483_p2 }
  0x28   :  { %p486_p5 = pnand %p485_p4, %p479_p1 }
  0x2a   :  { %489 = shalt.err (!%p486_p5)
}
  0x2b   :  { %67 = dma.hbm_to_vmem [thread:$0]  %s615_s5, 256, %s62_s16, [#allocation9], %s520_s29, %s520_s29, %s521_s30  }
  0x2c   :  { %510 = dma.done.wait [#allocation3], 128  }
  0x2d   :  { %511 = vsyncadd [#allocation3], 4294967168 }
  0x2e   :  { %512 = dma.done.wait [#allocation6], 768  }
  0x2f   :  { %513 = vsyncadd [#allocation6], 4294966528 }
  0x30   :  { %514 = dma.done.wait [#allocation9], 256  }
  0x31   :  { %515 = vsyncadd [#allocation9], 4294967040  ;;  %v524_v0 = vmov 0.0   ;;  %vm525_vm0 = vmmov 0   ;;  %v401_v1 = vld [vmem:[#allocation5 + $0x8] sm:$0xff]   ;;  %v402_v2 = vld [vmem:[#allocation5] sm:$0xff]  }
  0x32   :  { %362 = vmatprep.subr.bf16.mxu0 %v524_v0  ;;  %366 = vmatprep.mubr.msk.bf16.mxu0 %vm525_vm0, %v524_v0  ;;  %v404_v3 = vld [vmem:[#allocation7 + $0x18] sm:$0xff]   ;;  %v403_v4 = vld [vmem:[#allocation2] sm:$0xff]   ;;  %vm113_vm1 = vcmask 261120   ;;  %v405_v5 = vld [vmem:[#allocation7 + $0x10] sm:$0xff]   ;;  %vm200_vm2 = vcmask 523264   ;;  %s526_s24 = smov [#allocation10]  }
  0x33   :  { %370 = vmatprep.subr.bf16.mxu1 %v524_v0  ;;  %378 = vmatprep.mubr.msk.bf16.mxu1 %vm525_vm0, %v524_v0  ;;  %v406_v6 = vld [vmem:[#allocation7 + $0x8] sm:$0xff]   ;;  %v407_v7 = vld [vmem:[#allocation7] sm:$0xff]   ;;  %s322_s25 = sshll.u32 %s526_s24, 4  ;;  %s323_s25 = int_to_ptr.vmem [resolvable:$true] %s322_s25 }
  0x34   :  { %363 = vmatpush3.bf16.msra.mxu0 %v401_v1  ;;  %371 = vmatpush3.bf16.msra.mxu1 %v404_v3  ;;  %v336_v8 = vld [vmem:[%s612_s2] ss:$0 sm:$0xff]  ;;  %v409_v19 = vld [vmem:[#allocation8] sm:$0xff]   ;;  %p495_p7 = scmp.lt.s32.totalorder %s323_s25, %s323_s25 }
  0x35   :  { %364 = vmatprep.subr.bf16.mxu0 %v524_v0  ;;  %372 = vmatprep.subr.bf16.mxu1 %v524_v0  ;;  %v408_v18 = vld [vmem:[#allocation8 + $0x8] sm:$0xff]  }
  0x36   :  { %v341_v20 = vld [vmem:[%s614_s4] ss:$0 sm:$0xff]  ;;  %s490_s4 = scalar_lea.vmem %s323_s25, 256 }
  0x37   :  { %v347_v30 = vld [vmem:[%s616_s6] ss:$0 sm:$0xff]  ;;  %p491_p6 = scmp.ne.s32.totalorder %s323_s25, %s490_s4  ;;  %p496_p8 = scmp.lt.s32.totalorder %s490_s4, %s490_s4 }
  0x38   :  { %365 = vmatpush3.bf16.msra.mxu0 %v402_v2  ;;  %373 = vmatpush3.bf16.msra.mxu1 %v405_v5 }
  0x39   :  { %382 = vmatprep.subr.bf16.mxu0 %v524_v0  ;;  %374 = vmatprep.subr.bf16.mxu1 %v524_v0  ;;  %p497_p9 = por %p496_p8, %p495_p7 }
  0x3b   :  { %367 = vmatmul.mubr.msk.bf16.vlgmr.msra.gmra.mxu0 %vm113_vm1, %v403_v4  ;;  %p498_p10 = pnand %p497_p9, %p491_p6 }
  0x3c   :  { %386 = vmatprep.mubr.msk.bf16.mxu0 %vm525_vm0, %v524_v0  ;;  %375 = vmatpush3.bf16.msra.mxu1 %v406_v6 }
  0x3d   :  { %376 = vmatprep.subr.bf16.mxu1 %v524_v0  ;;  %383 = vmatpush3.bf16.msra.mxu0 %v408_v18 }
  0x3e   :  { %384 = vmatprep.subr.bf16.mxu0 %v524_v0 }
  0x40   :  { %377 = vmatpush3.bf16.msra.mxu1 %v407_v7 }
  0x41   :  { %385 = vmatpush3.bf16.msra.mxu0 %v409_v19 }
  0xfb   :  { %v151_v9 = vpop.f32.mrf.mxu0 }
  0xfc   :  { %v152_v11 = vadd.f32 %v336_v8, %v151_v9 }
  0xfd   :  { %v368_v10 = vpop.f32.mrf.mxu0 }
  0xfe   :  { %v158_v15 = vmax.f32 %v152_v11, 0.0 }
  0xff   :  { %v154_v12 = vpop.f32.mrf.mxu0 }
 0x100   :  { %v155_v13 = vadd.f32 %v336_v8, %v154_v12 }
 0x101   :  { %v369_v14 = vpop.f32.mrf.mxu0 }
 0x102   :  { %v159_v16 = vmax.f32 %v155_v13, 0.0 }
 0x104   :  { %v160_v17 = vpack.c.bf16 %v159_v16, %v158_v15 }
 0x106   :  { %379 = vmatmul.mubr.msk.bf16.vlgmr.msra.gmra.mxu1 %vm200_vm2, %v160_v17 }
 0x1c6   :  { %v238_v21 = vpop.f32.mrf.mxu1 }
 0x1c7   :  { %v239_v23 = vadd.f32 %v341_v20, %v238_v21 }
 0x1c8   :  { %v380_v22 = vpop.f32.mrf.mxu1 }
 0x1c9   :  { %v245_v27 = vmax.f32 %v239_v23, 0.0 }
 0x1ca   :  { %v241_v24 = vpop.f32.mrf.mxu1 }
 0x1cb   :  { %v242_v25 = vadd.f32 %v341_v20, %v241_v24 }
 0x1cc   :  { %v381_v26 = vpop.f32.mrf.mxu1 }
 0x1cd   :  { %v246_v28 = vmax.f32 %v242_v25, 0.0 }
 0x1cf   :  { %v247_v29 = vpack.c.bf16 %v246_v28, %v245_v27 }
 0x1d1   :  { %387 = vmatmul.mubr.msk.bf16.vlgmr.msra.gmra.mxu0 %vm113_vm1, %v247_v29 }
 0x291   :  { %v308_v31 = vpop.f32.mrf.mxu0 }
 0x292   :  { %v309_v32 = vadd.f32 %v347_v30, %v308_v31 }
 0x293   :  { %v388_v33 = vpop.f32.mrf.mxu0 }
 0x294   :  { %315 = vst [vmem:[#allocation10] sm:$0xff] %v309_v32 }
 0x295   :  { %v311_v34 = vpop.f32.mrf.mxu0 }
 0x296   :  { %v312_v35 = vadd.f32 %v347_v30, %v311_v34 }
 0x297   :  { %v389_v36 = vpop.f32.mrf.mxu0 }
 0x298   :  { %316 = vst [vmem:[#allocation10 + $0x8] sm:$0xff] %v312_v35 }
 0x299   :  { %501 = shalt.err (!%p498_p10)
}
 0x29a   :  { %s527_s26 = smov 128   ;;  %s528_s6 = smov 8  }
 0x29b   :  { %328 = dma.vmem_to_hbm [thread:$0]  %s323_s25, 256, %s617_s7, [#allocation4], %s527_s26, %s527_s26, %s528_s6  }
 0x29c   :  { %516 = dma.done.wait [#allocation4], 256  }
 0x29d   :  { %517 = vsyncadd [#allocation4], 4294967040 }
 0x29e   :  { %332 = vsyncpa [#allocation3], 1 }
 0x29f   :  { %333 = vsyncpa [#allocation6], 1 }
 0x2a0   :  { %334 = vsyncpa [#allocation9], 1 }
 0x2a1   :  { %335 = vsyncpa [#allocation4], 1 }

</bundles_post_ra>
